<compile_context>
chip_gen: v7x
topology: tpu7x:2x2x1
jax: 0.10.0
libtpu: 0.0.40
codegen_flags: <defaults>
</compile_context>

<pallas_src>
import jax
import jax.numpy as jnp
from jax import lax
from jax.experimental import pallas as pl
from jax.experimental.pallas import tpu as pltpu

KH = KW = 3  # kernel_size=(3, 3)


# ---------------------------------------------------------------------------
# Pass A: fused conv(h2h) + conv(l2h) + x2 nearest upsample + add + BN partials
# Grid over batch. Refs (batch dim squeezed):
#   xh_ref : (H+2,  (W+2)*Cin_h)      zero-padded high-res input, (w, c) lanes
#   xl_ref : (Hl+2, (Wl+2)*Cin_l)     zero-padded low-res input,  (w, c) lanes
#   wh_ref : (KH, (W+2)*Cin_h,  W*Cout)  high-path tap matrices
#   wl_ref : (KH, (Wl+2)*Cin_l, W*Cout)  low-path tap matrices, width-upsample
#                                        replication already folded in
#   uh_ref : (H, Hl)                  0/1 row-replication matrix (x2 nearest)
#   y_ref  : (H, W*Cout)              fused conv output (lane-dense)
#   sum_ref/sq_ref : (1, W*Cout)      per-batch partial BN statistics
# ---------------------------------------------------------------------------
def fused_conv_kernel(xh_ref, xl_ref, wh_ref, wl_ref, uh_ref,
                      y_ref, sum_ref, sq_ref):
    h_out, wc = y_ref.shape
    h_low = xl_ref.shape[0] - 2

    yh = jnp.zeros((h_out, wc), jnp.float32)
    yl = jnp.zeros((h_low, wc), jnp.float32)
    for kh in range(KH):  # static unroll over the 3 vertical taps
        yh = yh + jnp.dot(xh_ref[kh:kh + h_out, :], wh_ref[kh],
                          preferred_element_type=jnp.float32)
        yl = yl + jnp.dot(xl_ref[kh:kh + h_low, :], wl_ref[kh],
                          preferred_element_type=jnp.float32)

    # x2 nearest upsample along H as a tiny replication matmul (the width
    # upsample is already folded into wl_ref), then fuse the high/low add.
    y = yh + jnp.dot(uh_ref[...], yl, preferred_element_type=jnp.float32)

    y_ref[...] = y
    # Per-batch partial BN stats (per (w, c) lane; folded to per-channel in the
    # wrapper).  Single-pass E[y^2]-E[y]^2 in f32: fine at these magnitudes;
    # for very large N*H*W a shifted / Welford variant would be safer.
    sum_ref[...] = jnp.sum(y, axis=0, keepdims=True)
    sq_ref[...] = jnp.sum(y * y, axis=0, keepdims=True)


# ---------------------------------------------------------------------------
# Pass B: BatchNorm affine apply on the lane-dense y:  out = y*scale + shift
# scale/shift are per-channel values tiled W times to match the (w, c) lanes.
# ---------------------------------------------------------------------------
def bn_apply_kernel(y_ref, scale_ref, shift_ref, out_ref):
    out_ref[...] = y_ref[...] * scale_ref[...] + shift_ref[...]


# ---------------------------------------------------------------------------
# Wrapper-side weight preparation (tiny, runs once per call)
# ---------------------------------------------------------------------------
def _tap_matrices(w_oihw, w_out, upsample_to=None):
    """Build per-vertical-tap conv matrices.

    Returns M of shape (KH, (w_out+2)*Cin, w_final*Cout) with
      M[kh, p*Cin + c, w*Cout + o] = w[o, c, kh, p - w_src]   (0 if tap OOB)
    where w_src = w, or w//2 when the x2 width upsample is folded in
    (upsample_to is the full-resolution width in that case).
    """
    cout, cin = w_oihw.shape[0], w_oihw.shape[1]
    wp = w_out + 2  # padded width
    # sel[p, w, kw] = 1 iff padded column p feeds output column w via tap kw
    sel = (jnp.arange(wp)[:, None, None]
           == jnp.arange(w_out)[None, :, None] + jnp.arange(KW)[None, None, :]
           ).astype(w_oihw.dtype)
    w_t = jnp.transpose(w_oihw, (2, 3, 1, 0))             # (KH, KW, Cin, Cout)
    m = jnp.einsum('pwk,hkco->hpcwo', sel, w_t)           # (KH, wp, Cin, w_out, Cout)
    w_final = w_out
    if upsample_to is not None:
        # fold nearest x2 width upsample: out col w reads low-res col w//2
        rep = (jnp.arange(upsample_to)[None, :] // 2
               == jnp.arange(w_out)[:, None]).astype(m.dtype)   # (w_out, W)
        m = jnp.einsum('hpcjo,jw->hpcwo', m, rep)
        w_final = upsample_to
    return m.reshape(KH, wp * cin, w_final * cout)


# ---------------------------------------------------------------------------
# Full forward: LastOctaveConv + BatchNorm2d (training-mode batch stats)
# ---------------------------------------------------------------------------
def last_octave_cb(x_h, x_l, weights, gamma, beta, eps=1e-5):
    """x_h: (N, Cin_h, H, W), x_l: (N, Cin_l, H/2, W/2)  [NCHW, like PyTorch]."""
    N, cin_h, H, W = x_h.shape
    _, cin_l, Hl, Wl = x_l.shape
    cout = weights.shape[0]
    WC = W * cout

    # Split weights exactly like the PyTorch module (end_h_x = Cin*(1-alpha_in))
    wh_m = _tap_matrices(weights[:, :cin_h], W)                   # (3,(W+2)ch, W*Co)
    wl_m = _tap_matrices(weights[:, cin_h:], Wl, upsample_to=W)   # (3,(Wl+2)cl, W*Co)
    uh = (jnp.arange(H)[:, None] // 2
          == jnp.arange(Hl)[None, :]).astype(jnp.float32)         # (H, Hl)

    # NCHW -> (N, H+2, (W+2)*Cin): channels folded into the lane dim together
    # with width; 1-pixel zero halo applied here (inputs are the smallest
    # tensors in the pipeline, so this single extra copy is negligible).
    xh_f = jnp.pad(jnp.transpose(x_h, (0, 2, 3, 1)),
                   ((0, 0), (1, 1), (1, 1), (0, 0))
                   ).reshape(N, H + 2, (W + 2) * cin_h)
    xl_f = jnp.pad(jnp.transpose(x_l, (0, 2, 3, 1)),
                   ((0, 0), (1, 1), (1, 1), (0, 0))
                   ).reshape(N, Hl + 2, (Wl + 2) * cin_l)

    par = pltpu.CompilerParams(dimension_semantics=("parallel",))

    # ---- pass A: conv + upsample + add + per-batch BN partials --------------
    y, sums, sqs = pl.pallas_call(
        fused_conv_kernel,
        out_shape=(jax.ShapeDtypeStruct((N, H, WC), jnp.float32),
                   jax.ShapeDtypeStruct((N, 1, WC), jnp.float32),
                   jax.ShapeDtypeStruct((N, 1, WC), jnp.float32)),
        grid=(N,),
        in_specs=[
            pl.BlockSpec((None, H + 2, (W + 2) * cin_h), lambda n: (n, 0, 0)),
            pl.BlockSpec((None, Hl + 2, (Wl + 2) * cin_l), lambda n: (n, 0, 0)),
            pl.BlockSpec((KH, (W + 2) * cin_h, WC), lambda n: (0, 0, 0)),
            pl.BlockSpec((KH, (Wl + 2) * cin_l, WC), lambda n: (0, 0, 0)),
            pl.BlockSpec((H, Hl), lambda n: (0, 0)),
        ],
        out_specs=(
            pl.BlockSpec((None, H, WC), lambda n: (n, 0, 0)),
            pl.BlockSpec((None, 1, WC), lambda n: (n, 0, 0)),
            pl.BlockSpec((None, 1, WC), lambda n: (n, 0, 0)),
        ),
        compiler_params=par,
    )(xh_f, xl_f, wh_m, wl_m, uh)

    # ---- tiny cross-batch reduction of the BN partial statistics (glue) -----
    cnt = float(N * H * W)
    mean = jnp.sum(sums.reshape(N, W, cout), axis=(0, 1)) / cnt
    var = jnp.sum(sqs.reshape(N, W, cout), axis=(0, 1)) / cnt - mean * mean
    inv = lax.rsqrt(var + eps)
    scale = jnp.tile(gamma * inv, W)[None, :]                     # (1, W*Cout)
    shift = jnp.tile(beta - mean * gamma * inv, W)[None, :]       # (1, W*Cout)

    # ---- pass B: lane-dense BN affine apply ----------------------------------
    out_f = pl.pallas_call(
        bn_apply_kernel,
        out_shape=jax.ShapeDtypeStruct((N, H, WC), jnp.float32),
        grid=(N,),
        in_specs=[
            pl.BlockSpec((None, H, WC), lambda n: (n, 0, 0)),
            pl.BlockSpec((1, WC), lambda n: (0, 0)),
            pl.BlockSpec((1, WC), lambda n: (0, 0)),
        ],
        out_specs=pl.BlockSpec((None, H, WC), lambda n: (n, 0, 0)),
        compiler_params=par,
    )(y, scale, shift)

    # back to NCHW
    return jnp.transpose(out_f.reshape(N, H, W, cout), (0, 3, 1, 2))


# ---------------------------------------------------------------------------
# Pure-JAX reference (mirrors the PyTorch forward) for validation
# ---------------------------------------------------------------------------
def reference(x_h, x_l, weights, gamma, beta, eps=1e-5):
    cin_h = x_h.shape[1]
    wh = weights[:, :cin_h]
    wl = weights[:, cin_h:]
    dn = ("NCHW", "OIHW", "NCHW")
    yh = lax.conv_general_dilated(x_h, wh, (1, 1), [(1, 1), (1, 1)],
                                  dimension_numbers=dn)
    yl = lax.conv_general_dilated(x_l, wl, (1, 1), [(1, 1), (1, 1)],
                                  dimension_numbers=dn)
    yl_up = jnp.repeat(jnp.repeat(yl, 2, axis=2), 2, axis=3)
    y = yh + yl_up
    mean = jnp.mean(y, axis=(0, 2, 3), keepdims=True)
    var = jnp.var(y, axis=(0, 2, 3), keepdims=True)
    return ((y - mean) / jnp.sqrt(var + eps)) * gamma.reshape(1, -1, 1, 1) \
        + beta.reshape(1, -1, 1, 1)


if __name__ == "__main__":
    key = jax.random.PRNGKey(0)
    k1, k2, k3, k4, k5 = jax.random.split(key, 5)

    # in_channels=4, out_channels=8, kernel_size=(3,3), alpha_in=0.5, alpha_out=0.0
    N, Cin, Cout, H, W = 2, 4, 8, 16, 16
    cin_h = Cin // 2
    cin_l = Cin - cin_h

    x_h = jax.random.normal(k1, (N, cin_h, H, W), jnp.float32)
    x_l = jax.random.normal(k2, (N, cin_l, H // 2, W // 2), jnp.float32)
    weights = 0.1 * jax.random.normal(k3, (Cout, Cin, 3, 3), jnp.float32)
    gamma = 1.0 + 0.5 * jax.random.normal(k4, (Cout,), jnp.float32)
    beta = 0.1 * jax.random.normal(k5, (Cout,), jnp.float32)

    out = last_octave_cb(x_h, x_l, weights, gamma, beta)
    out = jax.block_until_ready(out)

    ref = reference(x_h, x_l, weights, gamma, beta)
    assert out.shape == (N, Cout, H, W), out.shape
    assert jnp.allclose(out, ref, atol=2e-3, rtol=2e-3), \
        float(jnp.max(jnp.abs(out - ref)))
    print("KERNEL_OK")
</pallas_src>

<mosaic_0001>
module attributes {stable_mosaic.version = 11 : i64} {
  func.func @fused_conv_kernel(%arg0: i32, %arg1: memref<1x18x36xf32, #tpu.memory_space<vmem>>, %arg2: memref<1x10x20xf32, #tpu.memory_space<vmem>>, %arg3: memref<3x36x128xf32, #tpu.memory_space<vmem>>, %arg4: memref<3x20x128xf32, #tpu.memory_space<vmem>>, %arg5: memref<16x8xf32, #tpu.memory_space<vmem>>, %arg6: memref<1x16x128xf32, #tpu.memory_space<vmem>>, %arg7: memref<1x1x128xf32, #tpu.memory_space<vmem>>, %arg8: memref<1x1x128xf32, #tpu.memory_space<vmem>>) attributes {dimension_semantics = [#tpu.dimension_semantics<parallel>], iteration_bounds = array<i64: 2>, scalar_prefetch = 0 : i64, scratch_operands = 0 : i64, tpu.core_type = #tpu.core_type<tc>, window_params = [{transform_indices = @transform_0, window_bounds = array<i64: 1, 18, 36>}, {transform_indices = @transform_1, window_bounds = array<i64: 1, 10, 20>}, {pipeline_mode = #tpu.pipeline_mode<synchronous>, transform_indices = @transform_2, window_bounds = array<i64: 3, 36, 128>}, {pipeline_mode = #tpu.pipeline_mode<synchronous>, transform_indices = @transform_3, window_bounds = array<i64: 3, 20, 128>}, {pipeline_mode = #tpu.pipeline_mode<synchronous>, transform_indices = @transform_4, window_bounds = array<i64: 16, 8>}, {transform_indices = @transform_5, window_bounds = array<i64: 1, 16, 128>}, {transform_indices = @transform_6, window_bounds = array<i64: 1, 1, 128>}, {transform_indices = @transform_7, window_bounds = array<i64: 1, 1, 128>}]} {
    %cst = arith.constant 0.000000e+00 : f32
    %0 = vector.broadcast %cst : f32 to vector<16x128xf32>
    %cst_0 = arith.constant 0.000000e+00 : f32
    %1 = vector.broadcast %cst_0 : f32 to vector<8x128xf32>
    %c0 = arith.constant 0 : index
    %c0_1 = arith.constant 0 : index
    %c0_2 = arith.constant 0 : index
    %2 = vector.load %arg1[%c0, %c0_1, %c0_2] : memref<1x18x36xf32, #tpu.memory_space<vmem>>, vector<1x16x36xf32>
    %3 = vector.shape_cast %2 : vector<1x16x36xf32> to vector<16x36xf32>
    %c0_3 = arith.constant 0 : index
    %c0_4 = arith.constant 0 : index
    %c0_5 = arith.constant 0 : index
    %4 = vector.load %arg3[%c0_3, %c0_4, %c0_5] : memref<3x36x128xf32, #tpu.memory_space<vmem>>, vector<1x36x128xf32>
    %5 = vector.shape_cast %4 : vector<1x36x128xf32> to vector<36x128xf32>
    %cst_6 = arith.constant dense<0.000000e+00> : vector<16x128xf32>
    %6 = tpu.matmul %3, %5, %cst_6 {dimension_numbers = #tpu.dot_dimension_numbers<[1], [0], [0], [1], [0, 0, 1, 1], [], []>} : vector<16x36xf32>, vector<36x128xf32>, vector<16x128xf32> -> vector<16x128xf32>
    %7 = arith.addf %0, %6 : vector<16x128xf32>
    %c0_7 = arith.constant 0 : index
    %c0_8 = arith.constant 0 : index
    %c0_9 = arith.constant 0 : index
    %8 = vector.load %arg2[%c0_7, %c0_8, %c0_9] : memref<1x10x20xf32, #tpu.memory_space<vmem>>, vector<1x8x20xf32>
    %9 = vector.shape_cast %8 : vector<1x8x20xf32> to vector<8x20xf32>
    %c0_10 = arith.constant 0 : index
    %c0_11 = arith.constant 0 : index
    %c0_12 = arith.constant 0 : index
    %10 = vector.load %arg4[%c0_10, %c0_11, %c0_12] : memref<3x20x128xf32, #tpu.memory_space<vmem>>, vector<1x20x128xf32>
    %11 = vector.shape_cast %10 : vector<1x20x128xf32> to vector<20x128xf32>
    %cst_13 = arith.constant dense<0.000000e+00> : vector<8x128xf32>
    %12 = tpu.matmul %9, %11, %cst_13 {dimension_numbers = #tpu.dot_dimension_numbers<[1], [0], [0], [1], [0, 0, 1, 1], [], []>} : vector<8x20xf32>, vector<20x128xf32>, vector<8x128xf32> -> vector<8x128xf32>
    %13 = arith.addf %1, %12 : vector<8x128xf32>
    %c0_14 = arith.constant 0 : index
    %c1 = arith.constant 1 : index
    %c0_15 = arith.constant 0 : index
    %14 = vector.load %arg1[%c0_14, %c1, %c0_15] : memref<1x18x36xf32, #tpu.memory_space<vmem>>, vector<1x16x36xf32>
    %15 = vector.shape_cast %14 : vector<1x16x36xf32> to vector<16x36xf32>
    %c1_16 = arith.constant 1 : index
    %c0_17 = arith.constant 0 : index
    %c0_18 = arith.constant 0 : index
    %16 = vector.load %arg3[%c1_16, %c0_17, %c0_18] : memref<3x36x128xf32, #tpu.memory_space<vmem>>, vector<1x36x128xf32>
    %17 = vector.shape_cast %16 : vector<1x36x128xf32> to vector<36x128xf32>
    %cst_19 = arith.constant dense<0.000000e+00> : vector<16x128xf32>
    %18 = tpu.matmul %15, %17, %cst_19 {dimension_numbers = #tpu.dot_dimension_numbers<[1], [0], [0], [1], [0, 0, 1, 1], [], []>} : vector<16x36xf32>, vector<36x128xf32>, vector<16x128xf32> -> vector<16x128xf32>
    %19 = arith.addf %7, %18 : vector<16x128xf32>
    %c0_20 = arith.constant 0 : index
    %c1_21 = arith.constant 1 : index
    %c0_22 = arith.constant 0 : index
    %20 = vector.load %arg2[%c0_20, %c1_21, %c0_22] : memref<1x10x20xf32, #tpu.memory_space<vmem>>, vector<1x8x20xf32>
    %21 = vector.shape_cast %20 : vector<1x8x20xf32> to vector<8x20xf32>
    %c1_23 = arith.constant 1 : index
    %c0_24 = arith.constant 0 : index
    %c0_25 = arith.constant 0 : index
    %22 = vector.load %arg4[%c1_23, %c0_24, %c0_25] : memref<3x20x128xf32, #tpu.memory_space<vmem>>, vector<1x20x128xf32>
    %23 = vector.shape_cast %22 : vector<1x20x128xf32> to vector<20x128xf32>
    %cst_26 = arith.constant dense<0.000000e+00> : vector<8x128xf32>
    %24 = tpu.matmul %21, %23, %cst_26 {dimension_numbers = #tpu.dot_dimension_numbers<[1], [0], [0], [1], [0, 0, 1, 1], [], []>} : vector<8x20xf32>, vector<20x128xf32>, vector<8x128xf32> -> vector<8x128xf32>
    %25 = arith.addf %13, %24 : vector<8x128xf32>
    %c0_27 = arith.constant 0 : index
    %c2 = arith.constant 2 : index
    %c0_28 = arith.constant 0 : index
    %26 = vector.load %arg1[%c0_27, %c2, %c0_28] : memref<1x18x36xf32, #tpu.memory_space<vmem>>, vector<1x16x36xf32>
    %27 = vector.shape_cast %26 : vector<1x16x36xf32> to vector<16x36xf32>
    %c2_29 = arith.constant 2 : index
    %c0_30 = arith.constant 0 : index
    %c0_31 = arith.constant 0 : index
    %28 = vector.load %arg3[%c2_29, %c0_30, %c0_31] : memref<3x36x128xf32, #tpu.memory_space<vmem>>, vector<1x36x128xf32>
    %29 = vector.shape_cast %28 : vector<1x36x128xf32> to vector<36x128xf32>
    %cst_32 = arith.constant dense<0.000000e+00> : vector<16x128xf32>
    %30 = tpu.matmul %27, %29, %cst_32 {dimension_numbers = #tpu.dot_dimension_numbers<[1], [0], [0], [1], [0, 0, 1, 1], [], []>} : vector<16x36xf32>, vector<36x128xf32>, vector<16x128xf32> -> vector<16x128xf32>
    %31 = arith.addf %19, %30 : vector<16x128xf32>
    %c0_33 = arith.constant 0 : index
    %c2_34 = arith.constant 2 : index
    %c0_35 = arith.constant 0 : index
    %32 = vector.load %arg2[%c0_33, %c2_34, %c0_35] : memref<1x10x20xf32, #tpu.memory_space<vmem>>, vector<1x8x20xf32>
    %33 = vector.shape_cast %32 : vector<1x8x20xf32> to vector<8x20xf32>
    %c2_36 = arith.constant 2 : index
    %c0_37 = arith.constant 0 : index
    %c0_38 = arith.constant 0 : index
    %34 = vector.load %arg4[%c2_36, %c0_37, %c0_38] : memref<3x20x128xf32, #tpu.memory_space<vmem>>, vector<1x20x128xf32>
    %35 = vector.shape_cast %34 : vector<1x20x128xf32> to vector<20x128xf32>
    %cst_39 = arith.constant dense<0.000000e+00> : vector<8x128xf32>
    %36 = tpu.matmul %33, %35, %cst_39 {dimension_numbers = #tpu.dot_dimension_numbers<[1], [0], [0], [1], [0, 0, 1, 1], [], []>} : vector<8x20xf32>, vector<20x128xf32>, vector<8x128xf32> -> vector<8x128xf32>
    %37 = arith.addf %25, %36 : vector<8x128xf32>
    %c0_40 = arith.constant 0 : index
    %c0_41 = arith.constant 0 : index
    %38 = vector.load %arg5[%c0_40, %c0_41] : memref<16x8xf32, #tpu.memory_space<vmem>>, vector<16x8xf32>
    %cst_42 = arith.constant dense<0.000000e+00> : vector<16x128xf32>
    %39 = tpu.matmul %38, %37, %cst_42 {dimension_numbers = #tpu.dot_dimension_numbers<[1], [0], [0], [1], [0, 0, 1, 1], [], []>} : vector<16x8xf32>, vector<8x128xf32>, vector<16x128xf32> -> vector<16x128xf32>
    %40 = arith.addf %31, %39 : vector<16x128xf32>
    %c0_43 = arith.constant 0 : index
    %c0_44 = arith.constant 0 : index
    %c0_45 = arith.constant 0 : index
    %41 = vector.load %arg6[%c0_43, %c0_44, %c0_45] : memref<1x16x128xf32, #tpu.memory_space<vmem>>, vector<1x16x128xf32>
    %42 = vector.shape_cast %41 : vector<1x16x128xf32> to vector<16x128xf32>
    %43 = vector.shape_cast %40 : vector<16x128xf32> to vector<1x16x128xf32>
    tpu.vector_store %arg6[%c0_43, %c0_44, %c0_45], %43 {strides = array<i32>} : memref<1x16x128xf32, #tpu.memory_space<vmem>>, vector<1x16x128xf32>,
    %cst_46 = arith.constant dense<0.000000e+00> : vector<128xf32>
    %44 = vector.multi_reduction <add>, %40, %cst_46 [0] : vector<16x128xf32> to vector<128xf32>
    %45 = vector.shape_cast %44 : vector<128xf32> to vector<1x128xf32>
    %c0_47 = arith.constant 0 : index
    %c0_48 = arith.constant 0 : index
    %c0_49 = arith.constant 0 : index
    %46 = vector.load %arg7[%c0_47, %c0_48, %c0_49] : memref<1x1x128xf32, #tpu.memory_space<vmem>>, vector<1x1x128xf32>
    %47 = vector.shape_cast %46 : vector<1x1x128xf32> to vector<1x128xf32>
    %48 = vector.shape_cast %45 : vector<1x128xf32> to vector<1x1x128xf32>
    tpu.vector_store %arg7[%c0_47, %c0_48, %c0_49], %48 {strides = array<i32>} : memref<1x1x128xf32, #tpu.memory_space<vmem>>, vector<1x1x128xf32>,
    %49 = arith.mulf %40, %40 : vector<16x128xf32>
    %cst_50 = arith.constant dense<0.000000e+00> : vector<128xf32>
    %50 = vector.multi_reduction <add>, %49, %cst_50 [0] : vector<16x128xf32> to vector<128xf32>
    %51 = vector.shape_cast %50 : vector<128xf32> to vector<1x128xf32>
    %c0_51 = arith.constant 0 : index
    %c0_52 = arith.constant 0 : index
    %c0_53 = arith.constant 0 : index
    %52 = vector.load %arg8[%c0_51, %c0_52, %c0_53] : memref<1x1x128xf32, #tpu.memory_space<vmem>>, vector<1x1x128xf32>
    %53 = vector.shape_cast %52 : vector<1x1x128xf32> to vector<1x128xf32>
    %54 = vector.shape_cast %51 : vector<1x128xf32> to vector<1x1x128xf32>
    tpu.vector_store %arg8[%c0_51, %c0_52, %c0_53], %54 {strides = array<i32>} : memref<1x1x128xf32, #tpu.memory_space<vmem>>, vector<1x1x128xf32>,
    return
  }
  func.func @transform_0(%arg0: i32) -> (i32, i32, i32) {
    %c0_i32 = arith.constant 0 : i32
    %c0_i32_0 = arith.constant 0 : i32
    %c0_i32_1 = arith.constant 0 : i32
    return %arg0, %c0_i32, %c0_i32_0 : i32, i32, i32
  }
  func.func @transform_1(%arg0: i32) -> (i32, i32, i32) {
    %c0_i32 = arith.constant 0 : i32
    %c0_i32_0 = arith.constant 0 : i32
    %c0_i32_1 = arith.constant 0 : i32
    return %arg0, %c0_i32, %c0_i32_0 : i32, i32, i32
  }
  func.func @transform_2(%arg0: i32) -> (i32, i32, i32) {
    %c0_i32 = arith.constant 0 : i32
    %c0_i32_0 = arith.constant 0 : i32
    %c0_i32_1 = arith.constant 0 : i32
    %c0_i32_2 = arith.constant 0 : i32
    return %c0_i32, %c0_i32_0, %c0_i32_1 : i32, i32, i32
  }
  func.func @transform_3(%arg0: i32) -> (i32, i32, i32) {
    %c0_i32 = arith.constant 0 : i32
    %c0_i32_0 = arith.constant 0 : i32
    %c0_i32_1 = arith.constant 0 : i32
    %c0_i32_2 = arith.constant 0 : i32
    return %c0_i32, %c0_i32_0, %c0_i32_1 : i32, i32, i32
  }
  func.func @transform_4(%arg0: i32) -> (i32, i32) {
    %c0_i32 = arith.constant 0 : i32
    %c0_i32_0 = arith.constant 0 : i32
    %c0_i32_1 = arith.constant 0 : i32
    return %c0_i32, %c0_i32_0 : i32, i32
  }
  func.func @transform_5(%arg0: i32) -> (i32, i32, i32) {
    %c0_i32 = arith.constant 0 : i32
    %c0_i32_0 = arith.constant 0 : i32
    %c0_i32_1 = arith.constant 0 : i32
    return %arg0, %c0_i32, %c0_i32_0 : i32, i32, i32
  }
  func.func @transform_6(%arg0: i32) -> (i32, i32, i32) {
    %c0_i32 = arith.constant 0 : i32
    %c0_i32_0 = arith.constant 0 : i32
    %c0_i32_1 = arith.constant 0 : i32
    return %arg0, %c0_i32, %c0_i32_0 : i32, i32, i32
  }
  func.func @transform_7(%arg0: i32) -> (i32, i32, i32) {
    %c0_i32 = arith.constant 0 : i32
    %c0_i32_0 = arith.constant 0 : i32
    %c0_i32_1 = arith.constant 0 : i32
    return %arg0, %c0_i32, %c0_i32_0 : i32, i32, i32
  }
}

</mosaic_0001>

<bundles_post_ra>
// kernel: tpu_custom_call.1
= control target key start
LH: loop header
LB: loop body
LE: loop exit
PB: predicated region body
PF: predicated region fallthrough
CT: control target
= control target key end

     0   :  { %13 = vsyncpa [#allocation3], 0  ;;  %s1920_s0 = inlined_call_operand.vmem [shape: f32[2,18,36], index: 0, kind: input, shape index: {}]   ;;  %s1921_s1 = inlined_call_operand.vmem [shape: f32[2,10,20], index: 1, kind: input, shape index: {}]   ;;  %s1922_s2 = inlined_call_operand.vmem [shape: f32[3,36,128], index: 2, kind: input, shape index: {}]   ;;  %s1923_s3 = inlined_call_operand.hbm [shape: f32[3,20,128], index: 3, kind: input, shape index: {}]   ;;  %s1924_s4 = inlined_call_operand.vmem [shape: f32[16,8], index: 4, kind: input, shape index: {}]   ;;  %s1925_s5 = inlined_call_operand.hbm [shape: f32[2,16,128], index: 5, kind: output, shape index: {0}]   ;;  %s1926_s6 = inlined_call_operand.hbm [shape: f32[2,1,128], index: 6, kind: output, shape index: {1}]   ;;  %s1927_s7 = inlined_call_operand.hbm [shape: f32[2,1,128], index: 7, kind: output, shape index: {2}]  }
   0x1   :  { %14 = vsyncpa [#allocation4], 0 }
   0x2   :  { %16 = vsyncpa [#allocation4 + $0x1], 0 }
   0x3   :  { %17 = vsyncpa [#allocation7], 0 }
   0x4   :  { %19 = vsyncpa [#allocation7 + $0x1], 0  ;;  %s1615_s24 = smov 0   ;;  %s1617_s25 = smov 0  }
   0x5   :  { %s1619_s26 = smov 0   ;;  %s1621_s27 = smov 0  }
   0x6 LB: > { %s1636_s28 = sadd.s32 4294967295, %s1562_s27   ;;  %s1931_s29 = sadd.s32 4294967294, %s1562_s27   ;;  %s1562_s27 = sphi %s1621_s27, %s1947_s27   ;;  %s1558_s26 = sphi %s1619_s26, %s1946_s26   ;;  %s1554_s25 = sphi %s1617_s25, %s1945_s25   ;;  %s1550_s24 = sphi %s1615_s24, %s1944_s24  }
   0x7   : > { %s1640_s30 = sadd.s32 1, %s1562_s27   ;;  %s147_s8 = sadd.s32 1, %s1558_s26 }
   0x8   : > { %s144_s9 = ssub.s32 %s1562_s27, %s1640_s30  ;;  %p157_p0 = scmp.ne.s32.totalorder %s1558_s26, %s1554_s25 }
   0x9   : > { %p145_p1 = scmp.eq.s32.totalorder %s144_s9, 0  ;;  %p158_p2 = scmp.eq.s32.totalorder %s1636_s28, 1 }
   0xa   : > { %p163_p3 = scmp.ne.s32.totalorder %s1554_s25, %s1550_s24  ;;  %p164_p4 = scmp.eq.s32.totalorder %s1931_s29, 1 }
   0xb   : > { %s1653_s10 = scalar_select %p145_p1, %s1558_s26, %s147_s8  }
   0xc   : > { %p1655_p5 = por %p158_p2, %p157_p0  ;;  %p1659_p6 = por %p164_p4, %p163_p3 }
   0xd   : > { %p1145_p7 = scmp.ge.s32.totalorder %s1562_s27, 1  ;;  %p223_p8 = scmp.lt.s32.totalorder %s1562_s27, 3 }
   0xe   : > { %s1933_s11 = scalar_select %p1655_p5, 1, 0 }
   0xf   : > { %s1934_s12 = scalar_select %p1659_p6, 1, 0 }
  0x10   : > { %p1928_p9 = scmp.eq.s32.totalorder %s1636_s28, 0  ;;  %p1666_p10 = pnand %p1145_p7, %p223_p8 }
  0x11   : > { %s1564_s14 = smov [#allocation2]   ;;  %s1408_s19 = scalar_lea.hbm %s1923_s3, 1152 }
  0x12   : > { %s1935_s13 = scalar_select %p1666_p10, 1, 0 }
  0x13   : > { %s238_s15 = sshll.u32 %s1564_s14, 4  ;;  %p1351_p11 = pneg %p1666_p10  ;;  %s239_s15 = int_to_ptr.vmem [resolvable:$true] %s238_s15 }
  0x14   : > { %p1409_p13 = scmp.ne.s32.totalorder %s1923_s3, %s1408_s19  ;;  %p1415_p3 = scmp.lt.u32.totalorder %s1408_s19, %s1923_s3 }
  0x15   : > { %p1674_p12 = pnand %p1928_p9, %p1351_p11 }
  0x17   : > { %p1410_p0 = pneg %p1674_p12 }
  0x19   : > { %p1411_p1 = pnand %p1410_p0, %p1409_p13 }
  0x1b   : > { %p1412_p2 = pneg %p1411_p1 }
  0x1d   : > { %p1417_p4 = pnand %p1415_p3, %p1412_p2 }
  0x1f   : > { %1420 = shalt.err (!%p1417_p4)
}
  0x20   : > { %s1421_s8 = scalar_lea.vmem %s239_s15, 1152  ;;  %p1429_p9 = scmp.lt.s32.totalorder %s239_s15, %s239_s15 }
  0x21   : > { %p1422_p7 = scmp.ne.s32.totalorder %s239_s15, %s1421_s8  ;;  %p1430_p6 = scmp.lt.s32.totalorder %s1421_s8, %s1421_s8 }
  0x23   : > { %p1424_p8 = pnand %p1422_p7, %p1410_p0  ;;  %p1431_p5 = por %p1430_p6, %p1429_p9 }
  0x25   : > { %p1425_p11 = pneg %p1424_p8 }
  0x27   : > { %p1432_p10 = pnand %p1431_p5, %p1425_p11 }
  0x29   : > { %1435 = shalt.err (!%p1432_p10)
}
  0x2a   : > { %s1565_s9 = smov 128   ;;  %s1566_s14 = smov 8  }
  0x2b   : > { %1354 = dma.hbm_to_vmem [thread:$0]  (!%p1674_p12), %s1923_s3, 1152, %s239_s15, [#allocation3], %s1565_s9, %s1565_s9, %s1566_s14  }
  0x2c   : > { %p1937_p13 = scmp.ne.s32.totalorder %s1935_s13, 0 }
  0x2d   : > { %p1938_p1 = scmp.eq.s32.totalorder (!%p1937_p13), %s1636_s28, 0 }
  0x2e   : > { %273 = sbr.rel (%p1937_p13) target bundleno = 583 (0x247), region = 40 }
  0x35   : > { %1537 = dma.done.wait (%p1938_p1), [#allocation3], 1152   ;;  %p1939_p0 = pmov %p1938_p1 }
  0x36   : > { %p318_p5 = scmp.lt.s32.totalorder %s1636_s28, 1  ;;  %vm347_vm0 = vcmask 293888   ;;  %v1154_v0 = vld [vmem:[%s1922_s2 + $0x28] sm:$0xff]  ;;  %v1155_v1 = vld [vmem:[%s1922_s2 + $0x30] sm:$0xff]  ;;  %v1156_v2 = vld [vmem:[%s1922_s2 + $0x38] sm:$0xff]  ;;  %vm354_vm1 = vcmask 1043456  }
  0x37   : > { %1539 = vsyncadd (%p1939_p0), [#allocation3], 4294966144  ;;  %v1297_v3 = vpack.c.bf16 %v1155_v1, %v1154_v0  ;;  %v1157_v4 = vld [vmem:[%s1922_s2 + $0x40] sm:$0xff]  ;;  %v1158_v7 = vld [vmem:[%s1922_s2 + $0x48] sm:$0xf]  ;;  %v1567_v15 = vmov 0.0|0.0  }
  0x38   : > { %s1702_s19 = scalar_select %p318_p5, %s1636_s28, 1  ;;  %v1301_v6 = vpack.c.bf16 %v1157_v4, %v1156_v2  ;;  %v330_v8 = vld [vmem:[%s1922_s2] sm:$0xff]  ;;  %v331_v9 = vld [vmem:[%s1922_s2 + $0x8] sm:$0xff]  ;;  %v519_v10 = vld [vmem:[#allocation2 + $0x18] sm:$0xff]  ;;  %vm1568_vm2 = vmmov 0   ;;  %v1569_v18 = vmov 0.0  }
  0x39   : > { %1298 = vmatprep.subr.bf16.mxu1 %v1297_v3  ;;  %v520_v11 = vld [vmem:[#allocation2 + $0x20] sm:$0xff]  ;;  %v1305_v12 = vpack.c.bf16 %v331_v9, %v330_v8  ;;  %v337_v17 = vld [vmem:[#allocation2 + $0x8] sm:$0xff]  ;;  %vm522_vm3 = vcmask 162816   ;;  %v338_v22 = vld [vmem:[#allocation2 + $0x10] sm:$0xf]  ;;  %vm853_vm4 = vcmask 64512  }
  0x3a   : > { %s1340_s16 = smul.u32 24, %s1702_s19  ;;  %1300 = vmatpush3.bf16.msra.mxu1 %v1297_v3  ;;  %v1314_v14 = vpack.c.bf16 %v520_v11, %v519_v10  ;;  %s1188_s8 = sshll.u32 %s1702_s19, 4  ;;  %v336_v16 = vld [vmem:[#allocation2] sm:$0xff]  ;;  %v521_v19 = vld [vmem:[#allocation2 + $0x28] sm:$0xf]  ;;  %v771_v23 = vld [vmem:[#allocation2 + $0x30] sm:$0xff] }
  0x3b   : > { %1302 = vmatprep.subr.bf16.mxu1 %v1301_v6  ;;  %1306 = vmatprep.subr.bf16.mxu0 %v1305_v12  ;;  %s1741_s17 = scalar_lea.vmem %s1921_s1, %s1188_s8  ;;  %v1317_v21 = vpack.c.bf16 %v337_v17, %v336_v16  ;;  %v772_v24 = vld [vmem:[#allocation2 + $0x38] sm:$0xff]  ;;  %v773_v27 = vld [vmem:[#allocation2 + $0x40] sm:$0xf]  ;;  %v332_v29 = vld [vmem:[%s1922_s2 + $0x10] sm:$0xff]  ;;  %p1940_p9 = scmp.ne.s32.totalorder %s1933_s11, 0 }
  0x3c   : > { %s1708_s15 = scalar_lea.vmem %s1920_s0, %s1340_s16  ;;  %1308 = vmatpush3.bf16.msra.mxu0 %v1305_v12  ;;  %v517_v20 = vld [vmem:[%s1741_s17 + $0x1] sm:$0xff]  ;;  %v1328_v26 = vpack.c.bf16 %v772_v24, %v771_v23  ;;  %v333_v30 = vld [vmem:[%s1922_s2 + $0x18] sm:$0xff]  ;;  %v1169_v34 = vld [vmem:[%s1922_s2 + $0x50] sm:$0xff]  ;;  %s1570_s13 = smov [#allocation5]  }
  0x3d   : > { %v339_v5 = vld [vmem:[%s1708_s15 + $0x1] sm:$0xff]  ;;  %v340_v13 = vld [vmem:[%s1708_s15 + $0x9] sm:$0xff]  ;;  %v1309_v31 = vpack.c.bf16 %v333_v30, %v332_v29  ;;  %v1170_v35 = vld [vmem:[%s1922_s2 + $0x58] sm:$0xff]  ;;  %s1440_s22 = sshll.u32 %s1570_s13, 4  ;;  %s1441_s22 = int_to_ptr.vmem [resolvable:$false] %s1440_s22 }
  0x3e   : > { %1236 = vmatprep.mubr.msk.f32.mxu1 %vm347_vm0, %v339_v5  ;;  %1304 = vmatpush3.bf16.msra.mxu1 %v1301_v6  ;;  %v335_v25 = vld [vmem:[%s1741_s17] sm:$0xff]  ;;  %v1319_v37 = vpack.c.bf16 %v1170_v35, %v1169_v34  ;;  %v1172_v38 = vld [vmem:[%s1922_s2 + $0x68] sm:$0xff]  ;;  %v1173_v42 = vld [vmem:[%s1922_s2 + $0x70] sm:$0xf]  ;;  %s1442_s23 = scalar_lea.vmem %s1441_s22, 512 }
  0x3f   : > { %1234 = vmatprep.subr.msk.mxu1 %vm354_vm1, %v1158_v7  ;;  %v769_v28 = vld [vmem:[%s1741_s17 + $0x2] sm:$0xff]  ;;  %1310 = vmatprep.subr.bf16.mxu0 %v1309_v31  ;;  %v676_v43 = vld [vmem:[%s1708_s15 + $0xa] sm:$0xff]  ;;  %s1189_s17 = sshll.u32 %s1636_s28, 8 }
  0x40   : > { %v334_v32 = vld [vmem:[%s1922_s2 + $0x20] sm:$0xf]  ;;  %1312 = vmatpush3.bf16.msra.mxu0 %v1309_v31  ;;  %v329_v39 = vld [vmem:[%s1708_s15 + $0x8] sm:$0xff]  ;;  %s1807_s16 = scalar_lea.hbm %s1925_s5, %s1189_s17 }
  0x41   : > { %v328_v33 = vld [vmem:[%s1708_s15] sm:$0xff]  ;;  %1247 = vmatprep.subr.msk.mxu0 %vm354_vm1, %v334_v32  ;;  %v852_v48 = vld [vmem:[%s1924_s4 + $0x8] sm:$0xff] }
  0x42   : > { %1235 = vmatpush3.msk.msra.mxu1 %vm354_vm1, %v1158_v7  ;;  %1249 = vmatprep.mubr.msk.f32.mxu0 %vm347_vm0, %v328_v33  ;;  %v1171_v36 = vld [vmem:[%s1922_s2 + $0x60] sm:$0xff] }
  0x43   : > { %1237 = vmatmul.mubr.msk.f32.vlgmr.msra.gmra.mrb[0].mxu1 %vm347_vm0, %v340_v13  ;;  %1313 = vmatprep.subr.bf16.mxu1 %v1567_v15  ;;  %v1323_v40 = vpack.c.bf16 %v1172_v38, %v1171_v36  ;;  %v675_v41 = vld [vmem:[%s1708_s15 + $0x2] sm:$0xff]  ;;  %s1798_s15 = sand.u32 1, %s1554_s25  }
  0x44   : > { %1315 = vmatpush3.bf16.msra.mxu1 %v1314_v14  ;;  %1258 = vmatprep.mubr.msk.f32.mxu1 %vm1568_vm2, %v1569_v18  ;;  %v851_v44 = vld [vmem:[%s1924_s4] sm:$0xff]  ;;  %s1150_s8 = sshll.u32 %s1798_s15, 4  ;;  %s958_s20 = scalar_lea.sflag [#allocation4], %s1798_s15 }
  0x45   : > { %1256 = vmatprep.subr.mxu1 %v1569_v18  ;;  %1248 = vmatpush3.msk.msra.mxu0 %vm354_vm1, %v334_v32  ;;  %s305_s9 = scalar_lea.vmem [#allocation5], %s1150_s8 }
  0x46   : > { %1320 = vmatprep.subr.bf16.mxu0 %v1319_v37  ;;  %1250 = vmatmul.mubr.msk.f32.vlgmr.msra.gmra.mrb[0].mxu0 %vm347_vm0, %v329_v39  ;;  %s979_s14 = sshll.u32 %s305_s9, 4  ;;  %s1802_s14 = int_to_ptr.vmem [resolvable:$true] %s979_s14 }
  0x47   : > { %1322 = vmatpush3.bf16.msra.mxu0 %v1319_v37  ;;  %1280 = vmatprep.mubr.msk.f32.mxu0 %vm347_vm0, %v675_v41  ;;  %s1436_s21 = scalar_lea.vmem %s1802_s14, 256  ;;  %p1443_p2 = scmp.lt.s32.totalorder %s1802_s14, %s1441_s22 }
  0x48   : > { %1257 = vmatpush3.msk.msra.mxu1 %vm354_vm1, %v521_v19  ;;  %1324 = vmatprep.subr.bf16.mxu0 %v1323_v40  ;;  %p1437_p6 = scmp.ne.s32.totalorder %s1802_s14, %s1436_s21  ;;  %p1444_p3 = scmp.lt.s32.totalorder %s1442_s23, %s1436_s21 }
  0x49   : > { %1259 = vmatmul.mubr.msk.f32.vlgmr.msra.gmra.mrb[2].mxu1 %vm522_vm3, %v517_v20  ;;  %1316 = vmatprep.subr.bf16.mxu1 %v1567_v15 }
  0x4a   : > { %1318 = vmatpush3.bf16.msra.mxu1 %v1317_v21  ;;  %1267 = vmatprep.mubr.msk.f32.mxu1 %vm1568_vm2, %v1569_v18  ;;  %p1438_p10 = pnand %p1437_p6, %p1940_p9  ;;  %p1445_p4 = por %p1444_p3, %p1443_p2 }
  0x4b   : > { %1265 = vmatprep.subr.mxu1 %v1569_v18  ;;  %1326 = vmatpush3.bf16.msra.mxu0 %v1323_v40 }
  0x4c   : > { %1278 = vmatprep.subr.msk.mxu0 %vm354_vm1, %v1173_v42  ;;  %p1439_p12 = pneg %p1438_p10 }
  0x4e   : > { %1266 = vmatpush3.msk.msra.mxu1 %vm354_vm1, %v338_v22  ;;  %p1446_p7 = pnand %p1445_p4, %p1439_p12 }
  0x4f   : > { %1327 = vmatprep.subr.bf16.mxu1 %v1567_v15  ;;  %1279 = vmatpush3.msk.msra.mxu0 %vm354_vm1, %v1173_v42 }
  0x50   : > { %1281 = vmatmul.mubr.msk.f32.vlgmr.msra.gmra.mrb[0].mxu0 %vm347_vm0, %v676_v43 }
  0x51   : > { %1268 = vmatmul.mubr.msk.f32.vlgmr.msra.gmra.mrb[2].mxu1 %vm522_vm3, %v335_v25  ;;  %1294 = vmatprep.mubr.msk.f32.mxu0 %vm853_vm4, %v851_v44 }
  0x52   : > { %1329 = vmatpush3.bf16.msra.mxu1 %v1328_v26  ;;  %1289 = vmatprep.mubr.msk.f32.mxu1 %vm1568_vm2, %v1569_v18 }
  0x53   : > { %1287 = vmatprep.subr.mxu1 %v1569_v18 }
  0x56   : > { %1288 = vmatpush3.msk.msra.mxu1 %vm354_vm1, %v773_v27 }
  0x59   : > { %1290 = vmatmul.mubr.msk.f32.vlgmr.msra.gmra.mrb[2].mxu1 %vm522_vm3, %v769_v28 }
 0x116   : > { %v1238_v45 = vpop.f32.mrb[0].mxu1 }
 0x117   : > { %v424_v46 = vpop.f32.mrb[1].mxu1 }
 0x12c   : > { %v846_v47 = vpop.f32.mrb[2].mxu1 }
 0x12d   : > { %v1291_v49 = vpop.f32.mrb[3].mxu1  ;;  %1292 = vmatprep.subr.mxu0 %v846_v47 }
 0x12e   : > { %1293 = vmatpush3.msra.mxu0 %v846_v47 }
 0x12f   : > { %1295 = vmatmul.mubr.msk.f32.vlgmr.msra.gmra.mrb[0].mxu0 %vm853_vm4, %v852_v48 }
 0x202   : > { %v1296_v50 = vpop.f32.mrb[0].mxu0 }
 0x203   : > { %v1330_v51 = vadd.f32 %v1296_v50, %v1238_v45  ;;  %v926_v52 = vpop.f32.mrb[1].mxu0 }
 0x204   : > { %v1331_v53 = vadd.f32 %v926_v52, %v424_v46 }
 0x205   : > { %938 = vst [vmem:[%s305_s9 + $0x8] sm:$0xff] %v1330_v51  ;;  %v948_v54 = vmul.f32 %v1330_v51, %v1330_v51 }
 0x206   : > { %937 = vst [vmem:[%s305_s9] sm:$0xff] %v1331_v53  ;;  %v939_v55 = vadd.f32 %v1331_v53, %v1330_v51  ;;  %v947_v56 = vmul.f32 %v1331_v53, %v1331_v53 }
 0x207   : > { %1449 = shalt.err (!%p1446_p7)
}
 0x208   : > { %s1450_s8 = scalar_lea.hbm %s1807_s16, 256  ;;  %s1454_s19 = scalar_lea.hbm %s1925_s5, 512 }
 0x209   : > { %p1451_p8 = scmp.ne.s32.totalorder %s1807_s16, %s1450_s8  ;;  %p1455_p1 = scmp.lt.u32.totalorder %s1807_s16, %s1925_s5 }
 0x20a   : > { %p1456_p0 = scmp.lt.u32.totalorder %s1454_s19, %s1450_s8  ;;  %p1458_p6 = scmp.lt.u32.totalorder %s1450_s8, %s1807_s16 }
 0x20b   : > { %p1452_p11 = pnand %p1451_p8, %p1940_p9 }
 0x20c   : > { %p1457_p5 = por %p1456_p0, %p1455_p1 }
 0x20d   : > { %p1453_p13 = pneg %p1452_p11 }
 0x20e   : > { %p1459_p10 = por %p1458_p6, %p1457_p5 }
 0x210   : > { %p1460_p12 = pnand %p1459_p10, %p1453_p13 }
 0x212   : > { %1463 = shalt.err (!%p1460_p12)
}
 0x213   : > { %s1571_s21 = smov 128   ;;  %s1572_s22 = smov 8   ;;  %v940_v57 = vrot.slane %v939_v55, 4  ;;  %v949_v58 = vadd.f32 %v948_v54, %v947_v56 }
 0x214   : > { %1345 = dma.vmem_to_hbm [thread:$0]  (%p1940_p9), %s1802_s14, 256, %s1807_s16, %s958_s20, %s1571_s21, %s1571_s21, %s1572_s22  }
 0x215   : > { %v941_v59 = vadd.f32 %v940_v57, %v939_v55  ;;  %v950_v60 = vrot.slane %v949_v58, 4  ;;  %s962_s23 = sand.u32 1, %s1636_s28   ;;  %s1184_s8 = sshll.u32 %s1636_s28, 4 }
 0x216   : > { %s311_s9 = scalar_lea.vmem [#allocation6], %s1798_s15  ;;  %s1932_s19 = scalar_lea.vmem [#allocation8], %s1798_s15 }
 0x217   : > { %v942_v61 = vrot.slane %v941_v59, 2  ;;  %v951_v62 = vadd.f32 %v950_v60, %v949_v58  ;;  %s995_s17 = sshll.u32 %s311_s9, 4  ;;  %s1008_s18 = sshll.u32 %s1932_s19, 4  ;;  %s1844_s17 = int_to_ptr.vmem [resolvable:$true] %s995_s17  ;;  %s1851_s18 = int_to_ptr.vmem [resolvable:$true] %s1008_s18 }
 0x218   : > { %s1842_s20 = scalar_lea.hbm %s1926_s6, %s1184_s8  ;;  %s1849_s21 = scalar_lea.hbm %s1927_s7, %s1184_s8 }
 0x219   : > { %v943_v63 = vadd.f32 %v942_v61, %v941_v59  ;;  %v952_v0 = vrot.slane %v951_v62, 2  ;;  %s1853_s22 = scalar_lea.sflag [#allocation7], %s962_s23  ;;  %s1464_s29 = scalar_lea.vmem %s1844_s17, 16 }
 0x21a   : > { %p1465_p2 = scmp.ne.s32.totalorder %s1844_s17, %s1464_s29  ;;  %s1573_s14 = smov [#allocation6]  }
 0x21b   : > { %v944_v1 = vrot.slane %v943_v63, 1  ;;  %v953_v2 = vadd.f32 %v952_v0, %v951_v62  ;;  %s1468_s16 = sshll.u32 %s1573_s14, 4  ;;  %s1469_s16 = int_to_ptr.vmem [resolvable:$false] %s1468_s16 }
 0x21c   : > { %p1466_p3 = pnand %p1465_p2, %p1940_p9  ;;  %s1470_s19 = scalar_lea.vmem %s1469_s16, 32 }
 0x21d   : > { %v954_v3 = vrot.slane %v953_v2, 1  ;;  %v945_v4 = vadd.f32 %v944_v1, %v943_v63  ;;  %p1471_p7 = scmp.lt.s32.totalorder %s1844_s17, %s1469_s16  ;;  %p1472_p8 = scmp.lt.s32.totalorder %s1470_s19, %s1464_s29 }
 0x21e   : > { %p1467_p4 = pneg %p1466_p3 }
 0x21f   : > { %946 = vst [vmem:[%s311_s9] sm:$0x1] %v945_v4  ;;  %v955_v5 = vadd.f32 %v954_v3, %v953_v2  ;;  %p1473_p11 = por %p1472_p8, %p1471_p7 }
 0x221   : > { %p1474_p13 = pnand %p1473_p11, %p1467_p4 }
 0x223   : > { %1477 = shalt.err (!%p1474_p13)
}
 0x224   : > { %s1478_s23 = scalar_lea.hbm %s1842_s20, 16  ;;  %s1482_s28 = scalar_lea.hbm %s1926_s6, 32 }
 0x225   : > { %p1479_p1 = scmp.ne.s32.totalorder %s1842_s20, %s1478_s23  ;;  %p1483_p6 = scmp.lt.u32.totalorder %s1842_s20, %s1926_s6 }
 0x226   : > { %p1484_p10 = scmp.lt.u32.totalorder %s1482_s28, %s1478_s23  ;;  %p1486_p2 = scmp.lt.u32.totalorder %s1478_s23, %s1842_s20 }
 0x227   : > { %p1480_p0 = pnand %p1479_p1, %p1940_p9 }
 0x228   : > { %p1485_p12 = por %p1484_p10, %p1483_p6 }
 0x229   : > { %p1481_p5 = pneg %p1480_p0 }
 0x22a   : > { %p1487_p3 = por %p1486_p2, %p1485_p12 }
 0x22c   : > { %p1488_p4 = pnand %p1487_p3, %p1481_p5 }
 0x22e   : > { %1491 = shalt.err (!%p1488_p4)
}
 0x22f   : > { %1346 = dma.vmem_to_hbm [thread:$0]  (%p1940_p9), %s1844_s17, 16, %s1842_s20, %s1853_s22  }
 0x230   : > { %s1941_s29 = scalar_lea.vmem [#allocation8], %s1798_s15  ;;  %s1492_s19 = scalar_lea.vmem %s1851_s18, 16 }
 0x231   : > { %956 = vst [vmem:[%s1941_s29] sm:$0x1] %v955_v5  ;;  %p1493_p7 = scmp.ne.s32.totalorder %s1851_s18, %s1492_s19  ;;  %s1574_s16 = smov [#allocation8]  }
 0x232   : > { %s1496_s23 = sshll.u32 %s1574_s16, 4  ;;  %s1497_s23 = int_to_ptr.vmem [resolvable:$false] %s1496_s23 }
 0x233   : > { %p1494_p8 = pnand %p1493_p7, %p1940_p9  ;;  %s1498_s8 = scalar_lea.vmem %s1497_s23, 32 }
 0x234   : > { %p1499_p13 = scmp.lt.s32.totalorder %s1851_s18, %s1497_s23  ;;  %p1500_p1 = scmp.lt.s32.totalorder %s1498_s8, %s1492_s19 }
 0x235   : > { %p1495_p11 = pneg %p1494_p8 }
 0x236   : > { %p1501_p0 = por %p1500_p1, %p1499_p13 }
 0x238   : > { %p1502_p5 = pnand %p1501_p0, %p1495_p11 }
 0x23a   : > { %1505 = shalt.err (!%p1502_p5)
}
 0x23b   : > { %s1506_s15 = scalar_lea.hbm %s1849_s21, 16  ;;  %s1510_s9 = scalar_lea.hbm %s1927_s7, 32 }
 0x23c   : > { %p1507_p6 = scmp.ne.s32.totalorder %s1849_s21, %s1506_s15  ;;  %p1511_p2 = scmp.lt.u32.totalorder %s1849_s21, %s1927_s7 }
 0x23d   : > { %p1512_p3 = scmp.lt.u32.totalorder %s1510_s9, %s1506_s15  ;;  %p1514_p7 = scmp.lt.u32.totalorder %s1506_s15, %s1849_s21 }
 0x23e   : > { %p1508_p10 = pnand %p1507_p6, %p1940_p9 }
 0x23f   : > { %p1513_p4 = por %p1512_p3, %p1511_p2 }
 0x240   : > { %p1509_p12 = pneg %p1508_p10 }
 0x241   : > { %p1515_p8 = por %p1514_p7, %p1513_p4 }
 0x243   : > { %p1516_p11 = pnand %p1515_p8, %p1509_p12 }
 0x245   : > { %1519 = shalt.err (!%p1516_p11)
}
 0x246   : > { %1347 = dma.vmem_to_hbm [thread:$0]  (%p1940_p9), %s1851_s18, 16, %s1849_s21, %s1853_s22  }
 0x247 PF: > { %p1367_p13 = scmp.ge.s32.totalorder %s1562_s27, 2  ;;  %s1020_s14 = sand.u32 1, %s1550_s24  }
 0x248   : > { %p1942_p1 = scmp.ne.s32.totalorder %s1934_s12, 0  ;;  %s1021_s29 = scalar_lea.sflag [#allocation4], %s1020_s14 }
 0x24a   : > { %p1356_p0 = pnand %p1367_p13, %p1942_p1 }
 0x24c   : > { %1541 = dma.done.wait (!%p1356_p0), %s1021_s29, 256  }
 0x24d   : > { %1543 = vsyncadd (!%p1356_p0), %s1021_s29, 4294967040  ;;  %s1943_s19 = sadd.s32 4294967294, %s1562_s27  }
 0x24e   : > { %s1029_s16 = sand.u32 1, %s1943_s19  }
 0x24f   : > { %s1030_s23 = scalar_lea.sflag [#allocation7], %s1029_s16 }
 0x250   : > { %1545 = dma.done.wait (!%p1356_p0), %s1030_s23, 32  }
 0x251   : > { %1547 = vsyncadd (!%p1356_p0), %s1030_s23, 4294967264  ;;  %p22_p9 = scmp.ge.s32.totalorder %s1640_s30, 4   ;;  %s1944_s24 = smov %s1554_s25 }
 0x252   : > { %s1945_s25 = smov %s1558_s26  ;;  %s1946_s26 = smov %s1653_s10 }
 0x253   : > { %s1947_s27 = smov %s1640_s30  ;;  %24 = sbr.rel (!%p22_p9) target bundleno = 6 (0x6), region = 119 }
 0x25a   :  { %1042 = vsyncpa [#allocation3], 1 }
 0x25b   :  { %1044 = vsyncpa [#allocation3 + $0x1], 1 }
 0x25c   :  { %1045 = vsyncpa [#allocation4], 1 }
 0x25d   :  { %1047 = vsyncpa [#allocation4 + $0x1], 1 }
 0x25e   :  { %1048 = vsyncpa [#allocation7], 1 }
 0x25f   :  { %1050 = vsyncpa [#allocation7 + $0x1], 1 }

</bundles_post_ra>
